<compile_context>
chip_gen: v7x
topology: tpu7x:2x2x1
jax: 0.10.0
libtpu: 0.0.40
codegen_flags: <defaults>
</compile_context>

<pallas_src>
import functools
import math

import jax
import jax.numpy as jnp
from jax.experimental import pallas as pl
from jax.experimental.pallas import tpu as pltpu


_MASK_FLOOR = -1e30  # keeps fully-masked rows finite (no exp(-inf-(-inf)) NaN)


# --------------------------- small helpers -----------------------------------
def _tile(dim, cap, align):
    """Largest tile <= cap that divides `dim` and is a multiple of `align`;
    falls back to the full extent (always a legal BlockSpec block)."""
    if dim <= cap:
        return dim
    t = (cap // align) * align
    while t > 0 and dim % t != 0:
        t -= align
    return t if t > 0 else dim


def _compiler_params(semantics, est_vmem_bytes):
    # Explicit VMEM limit: v5e's scoped default is only 16 MiB; cap at 64 MiB so
    # the same config also stays legal on v7x (64 MiB physical per TensorCore).
    limit = int(min(64 << 20, max(32 << 20, 2 * est_vmem_bytes)))
    return pltpu.CompilerParams(dimension_semantics=semantics,
                                vmem_limit_bytes=limit)


# --------------------------- linear (matmul + bias) ---------------------------
def _linear_kernel(x_ref, w_ref, b_ref, o_ref):
    # Whole reduction in one MXU pass; bias add + downcast on the way out.
    o_ref[...] = (
        jnp.dot(x_ref[...], w_ref[...], preferred_element_type=jnp.float32)
        + b_ref[...]
    ).astype(o_ref.dtype)


def _linear_acc_kernel(x_ref, w_ref, b_ref, o_ref, acc_ref):
    k = pl.program_id(2)

    @pl.when(k == 0)
    def _():
        acc_ref[...] = jnp.zeros_like(acc_ref)

    acc_ref[...] += jnp.dot(x_ref[...], w_ref[...],
                            preferred_element_type=jnp.float32)

    @pl.when(k == pl.num_programs(2) - 1)
    def _():
        o_ref[...] = (acc_ref[...] + b_ref[...]).astype(o_ref.dtype)


def linear(x, w, b, *, out_dtype=None, tm_cap=512, tn_cap=1024, tk_cap=1024):
    """y = x @ w + b.  x:(M,K) w:(K,N) b:(N,).  f32 accumulation on the MXU."""
    M, K = x.shape
    K2, N = w.shape
    assert K == K2
    out_dtype = out_dtype if out_dtype is not None else x.dtype
    b2 = b.reshape(1, N).astype(jnp.float32)

    tm = _tile(M, tm_cap, 8)
    tn = _tile(N, tn_cap, 128)
    tk = _tile(K, tk_cap, 128)
    osz = jnp.dtype(out_dtype).itemsize
    est = (2 * (tm * tk * x.dtype.itemsize + tk * tn * w.dtype.itemsize
                + tn * 4 + tm * tn * osz) + tm * tn * 4)

    if tk == K:
        # Single reduction step: no k grid axis, no accumulator revisits.
        # Grid (N-tiles, M-tiles), M innermost: the weight/bias block index is
        # constant along M, so the weight tile stays resident in VMEM and is
        # DMA'd once per N tile instead of once per (M, N) tile.
        grid = (N // tn, M // tm)
        return pl.pallas_call(
            _linear_kernel,
            out_shape=jax.ShapeDtypeStruct((M, N), out_dtype),
            grid_spec=pltpu.PrefetchScalarGridSpec(
                num_scalar_prefetch=0,
                grid=grid,
                in_specs=[
                    pl.BlockSpec((tm, K), lambda j, i: (i, 0)),
                    pl.BlockSpec((K, tn), lambda j, i: (0, j)),
                    pl.BlockSpec((1, tn), lambda j, i: (0, j)),
                ],
                out_specs=pl.BlockSpec((tm, tn), lambda j, i: (i, j)),
            ),
            compiler_params=_compiler_params(("parallel", "parallel"), est),
        )(x, w, b2)

    # Fallback for large K: accumulate over an innermost "arbitrary" k axis.
    grid = (M // tm, N // tn, K // tk)
    return pl.pallas_call(
        _linear_acc_kernel,
        out_shape=jax.ShapeDtypeStruct((M, N), out_dtype),
        grid_spec=pltpu.PrefetchScalarGridSpec(
            num_scalar_prefetch=0,
            grid=grid,
            in_specs=[
                pl.BlockSpec((tm, tk), lambda i, j, k: (i, k)),
                pl.BlockSpec((tk, tn), lambda i, j, k: (k, j)),
                pl.BlockSpec((1, tn), lambda i, j, k: (0, j)),
            ],
            out_specs=pl.BlockSpec((tm, tn), lambda i, j, k: (i, j)),
            scratch_shapes=[pltpu.VMEM((tm, tn), jnp.float32)],
        ),
        compiler_params=_compiler_params(
            ("parallel", "parallel", "arbitrary"), est),
    )(x, w, b2)


# --------------------------- flash attention core -----------------------------
def _attn_kernel(*refs, has_mask):
    if has_mask:
        q_ref, k_ref, v_ref, mask_ref, o_ref, m_sc, l_sc, acc_sc = refs
    else:
        q_ref, k_ref, v_ref, o_ref, m_sc, l_sc, acc_sc = refs
        mask_ref = None

    ki = pl.program_id(2)

    @pl.when(ki == 0)
    def _():
        m_sc[...] = jnp.full_like(m_sc, -jnp.inf)
        l_sc[...] = jnp.zeros_like(l_sc)
        acc_sc[...] = jnp.zeros_like(acc_sc)

    # Blocks arrive straight from the fused qkv buffer in (t, H, hd) layout;
    # rearrange to head-major in VMEM (XLU relayout only, no HBM traffic).
    q = jnp.swapaxes(q_ref[...], 0, 1)    # (H, tq, hd)  (already q-scaled)
    k = jnp.swapaxes(k_ref[...], 0, 1)    # (H, tkv, hd)
    v = jnp.swapaxes(v_ref[...], 0, 1)    # (H, tkv, hd)

    s = jnp.einsum('hqd,hkd->hqk', q, k,
                   preferred_element_type=jnp.float32)   # (H, tq, tkv) f32
    if mask_ref is not None:
        s = s + mask_ref[...].astype(jnp.float32)[None, :, :]
        s = jnp.maximum(s, _MASK_FLOOR)   # guard fully-masked query rows

    m_prev = m_sc[...]
    m_new = jnp.maximum(m_prev, jnp.max(s, axis=-1, keepdims=True))
    alpha = jnp.exp(m_prev - m_new)
    p = jnp.exp(s - m_new)
    l_sc[...] = alpha * l_sc[...] + jnp.sum(p, axis=-1, keepdims=True)
    acc_sc[...] = alpha * acc_sc[...] + jnp.einsum(
        'hqk,hkd->hqd', p.astype(v.dtype), v,
        preferred_element_type=jnp.float32)
    m_sc[...] = m_new

    @pl.when(ki == pl.num_programs(2) - 1)
    def _():
        inv_l = pl.reciprocal(l_sc[...], approx=True)      # EUP, not VALU
        ctx = jnp.swapaxes(acc_sc[...] * inv_l, 0, 1)      # (tq, H, hd)
        tq_, n_heads, head_dim = ctx.shape
        # Lane-dense (tq, E) store into the (B, T, E) output slab.
        o_ref[...] = ctx.reshape(tq_, n_heads * head_dim).astype(o_ref.dtype)


def _flash_attention(qkv5, mask4, *, out_dtype, tq_cap=256, tkv_cap=256):
    """qkv5: (B, T, 3, H, hd) fused projection; mask4: (B, 1, T, S) or None.

    Grid (B, q-tile, kv-tile); each grid step processes ALL heads, so the mask
    tile is fetched once per (b, q, kv) rather than once per head.  kv is the
    innermost "arbitrary" reduction axis.  Tile caps of 256 keep the per-step
    (H, tq, tkv) f32 score block modest even at H=16-32 so the config fits all
    generations (incl. v7x's 32 MiB scoped default)."""
    B, T, three, H, hd = qkv5.shape
    assert three == 3
    S = T  # self-attention
    E = H * hd

    tq = _tile(T, tq_cap, 8)
    tkv = _tile(S, tkv_cap, 128)   # lane axis of the mask / score tiles
    grid = (B, T // tq, S // tkv)

    in_specs = [
        pl.BlockSpec((None, tq, None, H, hd),
                     lambda b, qi, ki: (b, qi, 0, 0, 0)),
        pl.BlockSpec((None, tkv, None, H, hd),
                     lambda b, qi, ki: (b, ki, 1, 0, 0)),
        pl.BlockSpec((None, tkv, None, H, hd),
                     lambda b, qi, ki: (b, ki, 2, 0, 0)),
    ]
    inputs = [qkv5, qkv5, qkv5]    # same buffer, three windows (Q / K / V)
    has_mask = mask4 is not None
    if has_mask:
        assert mask4.shape == (B, 1, T, S), mask4.shape
        in_specs.append(
            pl.BlockSpec((None, None, tq, tkv),
                         lambda b, qi, ki: (b, 0, qi, ki)))
        inputs.append(mask4)

    qsz = qkv5.dtype.itemsize
    osz = jnp.dtype(out_dtype).itemsize
    est = (2 * ((tq + 2 * tkv) * H * hd * qsz
                + tq * E * osz
                + (tq * tkv * mask4.dtype.itemsize if has_mask else 0))
           + H * tq * (hd + 2) * 4          # f32 m/l/acc scratch
           + 2 * H * tq * tkv * 4)          # s / p temporaries

    return pl.pallas_call(
        functools.partial(_attn_kernel, has_mask=has_mask),
        out_shape=jax.ShapeDtypeStruct((B, T, E), out_dtype),
        grid_spec=pltpu.PrefetchScalarGridSpec(
            num_scalar_prefetch=0,
            grid=grid,
            in_specs=in_specs,
            out_specs=pl.BlockSpec((None, tq, E), lambda b, qi, ki: (b, qi, 0)),
            scratch_shapes=[
                pltpu.VMEM((H, tq, 1), jnp.float32),    # running max
                pltpu.VMEM((H, tq, 1), jnp.float32),    # running denom
                pltpu.VMEM((H, tq, hd), jnp.float32),   # output accumulator
            ],
        ),
        compiler_params=_compiler_params(
            ("parallel", "parallel", "arbitrary"), est),
    )(*inputs)


# --------------------------- BartAttention forward ----------------------------
def prepare_params(params, num_heads, *, compute_dtype=jnp.bfloat16):
    """One-time parameter prep (run at setup, NOT per forward call):
    fuse QKV weights/biases, fold the head_dim**-0.5 query scale into them and
    cast MXU operands to the compute dtype (bf16 by default; accumulation and
    biases stay f32 inside the kernels)."""
    E = params['wq'].shape[0]
    hd = E // num_heads
    scaling = hd ** -0.5
    w_qkv = jnp.concatenate(
        [params['wq'] * scaling, params['wk'], params['wv']], axis=1)
    b_qkv = jnp.concatenate(
        [params['bq'] * scaling, params['bk'], params['bv']], axis=0)
    return {
        'w_qkv': w_qkv.astype(compute_dtype),
        'b_qkv': b_qkv.astype(jnp.float32),
        'wo': params['wo'].astype(compute_dtype),
        'bo': params['bo'].astype(jnp.float32),
        'num_heads': num_heads,
        'compute_dtype': compute_dtype,
    }


def bart_attention(prepared, hidden_states, attention_mask=None, *,
                   is_decoder=False):
    """Pallas BartAttention.forward (self-attention path, eval mode).

    Returns (attn_output, attn_weights_reshaped=None, past_key_value)."""
    B, T, E = hidden_states.shape
    H = prepared['num_heads']
    hd = E // H
    assert hd * H == E
    cdt = prepared['compute_dtype']

    x2d = hidden_states.reshape(B * T, E).astype(cdt)

    # Fused QKV projection: one pass over the activations and the weights.
    qkv = linear(x2d, prepared['w_qkv'], prepared['b_qkv'], out_dtype=cdt)
    # Free (metadata-only) view: the 3E columns are [q | k | v], each E = H*hd,
    # so (B*T, 3E) == (B, T, 3, H, hd) with no data movement / no head split.
    qkv5 = qkv.reshape(B, T, 3, H, hd)

    mask4 = None
    if attention_mask is not None:
        # Module contract: additive mask of shape (bsz, 1, tgt_len, src_len).
        mask4 = attention_mask.astype(cdt)

    ctx = _flash_attention(qkv5, mask4, out_dtype=cdt)          # (B, T, E)

    out = linear(ctx.reshape(B * T, E), prepared['wo'], prepared['bo'],
                 out_dtype=hidden_states.dtype).reshape(B, T, E)

    past_key_value = None
    if is_decoder:
        # The torch module caches K/V in (B, H, T, hd) layout; this transpose
        # only runs on the decoder path.
        k = jnp.transpose(qkv5[:, :, 1], (0, 2, 1, 3))
        v = jnp.transpose(qkv5[:, :, 2], (0, 2, 1, 3))
        past_key_value = (k.astype(hidden_states.dtype),
                          v.astype(hidden_states.dtype))

    # TODO(synk): cross-attention (key_value_states), past_key_value cache
    # concat, focused_attention / hard_attention re-weighting and
    # output_attentions=True (materialized attention matrix) are not
    # implemented; dropout is a no-op (p=0.0 / eval mode).
    return out, None, past_key_value


# ------------------------------- reference ------------------------------------
def bart_attention_ref(params, hidden_states, attention_mask, num_heads):
    B, T, E = hidden_states.shape
    H = num_heads
    hd = E // H
    q = (hidden_states @ params['wq'] + params['bq']) * (hd ** -0.5)
    k = hidden_states @ params['wk'] + params['bk']
    v = hidden_states @ params['wv'] + params['bv']

    def shp(t):
        return t.reshape(B, T, H, hd).transpose(0, 2, 1, 3)

    q, k, v = shp(q), shp(k), shp(v)
    s = jnp.einsum('bhqd,bhkd->bhqk', q, k)
    if attention_mask is not None:
        s = s + attention_mask
    p = jax.nn.softmax(s, axis=-1)
    o = jnp.einsum('bhqk,bhkd->bhqd', p, v)
    o = o.transpose(0, 2, 1, 3).reshape(B, T, E)
    return o @ params['wo'] + params['bo']


# --------------------------------- main ----------------------------------------
if __name__ == "__main__":
    # Small BART-like config: batch=2, seq=8, hidden=32, heads=4 (head_dim=8).
    B, T, E, H = 2, 8, 32, 4

    key = jax.random.PRNGKey(0)
    ks = jax.random.split(key, 10)

    def w_init(k):
        return (jax.random.normal(k, (E, E), dtype=jnp.float32)
                * (1.0 / math.sqrt(E)))

    params = {
        'wq': w_init(ks[0]), 'bq': jax.random.normal(ks[1], (E,)) * 0.02,
        'wk': w_init(ks[2]), 'bk': jax.random.normal(ks[3], (E,)) * 0.02,
        'wv': w_init(ks[4]), 'bv': jax.random.normal(ks[5], (E,)) * 0.02,
        'wo': w_init(ks[6]), 'bo': jax.random.normal(ks[7], (E,)) * 0.02,
    }

    hidden_states = jax.random.normal(ks[8], (B, T, E), dtype=jnp.float32)

    # Additive (B, 1, T, S) padding-style mask: last two key positions of
    # batch 1 are masked out.
    mask = jnp.zeros((B, 1, T, T), dtype=jnp.float32)
    mask = mask.at[1, :, :, -2:].set(-1e9)

    ref0 = bart_attention_ref(params, hidden_states, None, H)
    ref1 = bart_attention_ref(params, hidden_states, mask, H)

    # ---- f32 compute path (tight correctness check) --------------------------
    prep_f32 = prepare_params(params, H, compute_dtype=jnp.float32)

    out0, attn_w0, pkv0 = bart_attention(prep_f32, hidden_states, None)
    out0 = jax.block_until_ready(out0)
    assert out0.shape == (B, T, E)
    assert attn_w0 is None and pkv0 is None
    assert jnp.allclose(out0, ref0, atol=5e-3, rtol=5e-3)

    out1, _, pkv1 = bart_attention(prep_f32, hidden_states, mask,
                                   is_decoder=True)
    out1 = jax.block_until_ready(out1)
    assert out1.shape == (B, T, E)
    assert jnp.allclose(out1, ref1, atol=5e-3, rtol=5e-3)
    assert pkv1[0].shape == (B, H, T, E // H)
    assert pkv1[1].shape == (B, H, T, E // H)

    # ---- bf16 MXU path (default production config, f32 accumulation) ---------
    prep_bf16 = prepare_params(params, H)   # compute_dtype = bfloat16
    out2, _, _ = bart_attention(prep_bf16, hidden_states, mask)
    out2 = jax.block_until_ready(out2)
    assert out2.dtype == hidden_states.dtype
    assert jnp.allclose(out2, ref1, atol=1e-1, rtol=1e-1)

    print("KERNEL_OK")
</pallas_src>

<mosaic_0001>
module attributes {stable_mosaic.version = 11 : i64} {
  func.func @_linear_kernel(%arg0: i32, %arg1: i32, %arg2: memref<16x32xf32, #tpu.memory_space<vmem>>, %arg3: memref<32x96xf32, #tpu.memory_space<vmem>>, %arg4: memref<1x96xf32, #tpu.memory_space<vmem>>, %arg5: memref<16x96xf32, #tpu.memory_space<vmem>>) attributes {dimension_semantics = [#tpu.dimension_semantics<parallel>, #tpu.dimension_semantics<parallel>], iteration_bounds = array<i64: 1, 1>, scalar_prefetch = 0 : i64, scratch_operands = 0 : i64, tpu.core_type = #tpu.core_type<tc>, window_params = [{transform_indices = @transform_0, window_bounds = array<i64: 16, 32>}, {transform_indices = @transform_1, window_bounds = array<i64: 32, 96>}, {transform_indices = @transform_2, window_bounds = array<i64: 1, 96>}, {transform_indices = @transform_3, window_bounds = array<i64: 16, 96>}]} {
    %c0 = arith.constant 0 : index
    %c0_0 = arith.constant 0 : index
    %0 = vector.load %arg2[%c0, %c0_0] : memref<16x32xf32, #tpu.memory_space<vmem>>, vector<16x32xf32>
    %c0_1 = arith.constant 0 : index
    %c0_2 = arith.constant 0 : index
    %1 = vector.load %arg3[%c0_1, %c0_2] : memref<32x96xf32, #tpu.memory_space<vmem>>, vector<32x96xf32>
    %cst = arith.constant dense<0.000000e+00> : vector<16x96xf32>
    %2 = tpu.matmul %0, %1, %cst {dimension_numbers = #tpu.dot_dimension_numbers<[1], [0], [0], [1], [0, 0, 1, 1], [], []>} : vector<16x32xf32>, vector<32x96xf32>, vector<16x96xf32> -> vector<16x96xf32>
    %c0_3 = arith.constant 0 : index
    %c0_4 = arith.constant 0 : index
    %3 = vector.load %arg4[%c0_3, %c0_4] : memref<1x96xf32, #tpu.memory_space<vmem>>, vector<1x96xf32>
    %4 = vector.broadcast %3 : vector<1x96xf32> to vector<16x96xf32>
    %5 = arith.addf %2, %4 : vector<16x96xf32>
    %c0_5 = arith.constant 0 : index
    %c0_6 = arith.constant 0 : index
    %6 = vector.load %arg5[%c0_5, %c0_6] : memref<16x96xf32, #tpu.memory_space<vmem>>, vector<16x96xf32>
    tpu.vector_store %arg5[%c0_5, %c0_6], %5 {strides = array<i32>} : memref<16x96xf32, #tpu.memory_space<vmem>>, vector<16x96xf32>,
    return
  }
  func.func @transform_0(%arg0: i32, %arg1: i32) -> (i32, i32) {
    %c0_i32 = arith.constant 0 : i32
    %c0_i32_0 = arith.constant 0 : i32
    return %arg1, %c0_i32 : i32, i32
  }
  func.func @transform_1(%arg0: i32, %arg1: i32) -> (i32, i32) {
    %c0_i32 = arith.constant 0 : i32
    %c0_i32_0 = arith.constant 0 : i32
    return %c0_i32, %arg0 : i32, i32
  }
  func.func @transform_2(%arg0: i32, %arg1: i32) -> (i32, i32) {
    %c0_i32 = arith.constant 0 : i32
    %c0_i32_0 = arith.constant 0 : i32
    return %c0_i32, %arg0 : i32, i32
  }
  func.func @transform_3(%arg0: i32, %arg1: i32) -> (i32, i32) {
    %c0_i32 = arith.constant 0 : i32
    return %arg1, %arg0 : i32, i32
  }
}

</mosaic_0001>

<bundles_post_ra>
// kernel: tpu_custom_call.1
= control target key start
LH: loop header
LB: loop body
LE: loop exit
PB: predicated region body
PF: predicated region fallthrough
CT: control target
= control target key end

     0   :  { %8 = vsyncpa [#allocation3], 0  ;;  %s337_s0 = inlined_call_operand.hbm [shape: f32[16,32], index: 0, kind: input, shape index: {}]   ;;  %s338_s1 = inlined_call_operand.hbm [shape: f32[32,96], index: 1, kind: input, shape index: {}]   ;;  %s339_s2 = inlined_call_operand.vmem [shape: f32[1,96], index: 2, kind: input, shape index: {}]   ;;  %s340_s3 = inlined_call_operand.hbm [shape: f32[16,96], index: 3, kind: output, shape index: {}]  }
   0x1   :  { %9 = vsyncpa [#allocation6], 0 }
   0x2   :  { %10 = vsyncpa [#allocation4], 0  ;;  %s264_s12 = smov [#allocation2]   ;;  %s192_s16 = scalar_lea.hbm %s337_s0, 256 }
   0x3   :  { %s16_s13 = sshll.u32 %s264_s12, 4  ;;  %p193_p0 = scmp.ne.s32.totalorder %s337_s0, %s192_s16  ;;  %s17_s13 = int_to_ptr.vmem [resolvable:$true] %s16_s13 }
   0x4   :  { %p196_p1 = scmp.lt.u32.totalorder %s192_s16, %s337_s0 }
   0x6   :  { %p198_p2 = pnand %p196_p1, %p193_p0 }
   0x8   :  { %201 = shalt.err (!%p198_p2)
}
   0x9   :  { %s202_s21 = scalar_lea.vmem %s17_s13, 256  ;;  %p207_p4 = scmp.lt.s32.totalorder %s17_s13, %s17_s13 }
   0xa   :  { %p203_p3 = scmp.ne.s32.totalorder %s17_s13, %s202_s21  ;;  %p208_p5 = scmp.lt.s32.totalorder %s202_s21, %s202_s21 }
   0xc   :  { %p209_p6 = por %p208_p5, %p207_p4 }
   0xe   :  { %p210_p7 = pnand %p209_p6, %p203_p3 }
  0x10   :  { %213 = shalt.err (!%p210_p7)
}
  0x11   :  { %s265_s22 = smov 128   ;;  %s266_s23 = smov 8  }
  0x12   :  { %22 = dma.hbm_to_vmem [thread:$0]  %s337_s0, 256, %s17_s13, [#allocation3], %s265_s22, %s265_s22, %s266_s23  }
  0x13   :  { %s267_s26 = smov [#allocation5]   ;;  %s214_s30 = scalar_lea.hbm %s338_s1, 512 }
  0x14   :  { %s28_s27 = sshll.u32 %s267_s26, 4  ;;  %p215_p8 = scmp.ne.s32.totalorder %s338_s1, %s214_s30  ;;  %s29_s27 = int_to_ptr.vmem [resolvable:$true] %s28_s27 }
  0x15   :  { %p218_p9 = scmp.lt.u32.totalorder %s214_s30, %s338_s1 }
  0x17   :  { %p220_p10 = pnand %p218_p9, %p215_p8 }
  0x19   :  { %223 = shalt.err (!%p220_p10)
}
  0x1a   :  { %s224_s8 = scalar_lea.vmem %s29_s27, 512  ;;  %p229_p12 = scmp.lt.s32.totalorder %s29_s27, %s29_s27 }
  0x1b   :  { %p225_p11 = scmp.ne.s32.totalorder %s29_s27, %s224_s8  ;;  %p230_p13 = scmp.lt.s32.totalorder %s224_s8, %s224_s8 }
  0x1d   :  { %p231_p0 = por %p230_p13, %p229_p12 }
  0x1f   :  { %p232_p1 = pnand %p231_p0, %p225_p11 }
  0x21   :  { %235 = shalt.err (!%p232_p1)
}
  0x22   :  { %34 = dma.hbm_to_vmem [thread:$0]  %s338_s1, 512, %s29_s27, [#allocation6], %s265_s22, %s265_s22, %s266_s23  }
  0x23   :  { %258 = dma.done.wait [#allocation3], 256  }
  0x24   :  { %259 = vsyncadd [#allocation3], 4294967040 }
  0x25   :  { %260 = dma.done.wait [#allocation6], 512  }
  0x26   :  { %261 = vsyncadd [#allocation6], 4294966784  ;;  %vm56_vm0 = vcmask 261120   ;;  %v45_v0 = vld [vmem:[#allocation5] sm:$0xff]  ;;  %v46_v1 = vld [vmem:[#allocation5 + $0x8] sm:$0xff]  ;;  %s268_s11 = smov [#allocation7]  }
  0x27   :  { %v47_v2 = vld [vmem:[#allocation5 + $0x10] sm:$0xff]  ;;  %v179_v3 = vpack.c.bf16 %v46_v1, %v45_v0  ;;  %v48_v4 = vld [vmem:[#allocation5 + $0x18] sm:$0xff]  ;;  %s146_s12 = sshll.u32 %s268_s11, 4  ;;  %vm138_vm1 = vcmask 785408   ;;  %s147_s12 = int_to_ptr.vmem [resolvable:$true] %s146_s12 }
  0x28   :  { %v43_v5 = vld [vmem:[#allocation2] sm:$0xff]  ;;  %v183_v6 = vpack.c.bf16 %v48_v4, %v47_v2  ;;  %v44_v7 = vld [vmem:[#allocation2 + $0x8] sm:$0xff]  ;;  %s236_s13 = scalar_lea.vmem %s147_s12, 256  ;;  %p241_p3 = scmp.lt.s32.totalorder %s147_s12, %s147_s12 }
  0x29   :  { %176 = vmatprep.mubr.msk.f32.mxu0 %vm56_vm0, %v43_v5  ;;  %180 = vmatprep.subr.bf16.mxu0 %v179_v3  ;;  %v159_v8 = vld [vmem:[%s339_s2] ss:$0 sm:$0xff]  ;;  %p237_p2 = scmp.ne.s32.totalorder %s147_s12, %s236_s13  ;;  %p242_p4 = scmp.lt.s32.totalorder %s236_s13, %s236_s13 }
  0x2a   :  { %182 = vmatpush3.bf16.msra.mxu0 %v179_v3 }
  0x2b   :  { %184 = vmatprep.subr.bf16.mxu0 %v183_v6  ;;  %p243_p5 = por %p242_p4, %p241_p3 }
  0x2d   :  { %p244_p6 = pnand %p243_p5, %p237_p2 }
  0x2e   :  { %186 = vmatpush3.bf16.msra.mxu0 %v183_v6 }
  0x31   :  { %177 = vmatmul.mubr.msk.f32.vlgmr.msra.gmra.mrb[0].mxu0 %vm56_vm0, %v44_v7 }
 0x104   :  { %v178_v9 = vpop.f32.mrb[0].mxu0 }
 0x105   :  { %v135_v10 = vadd.f32 %v178_v9, %v159_v8  ;;  %v129_v11 = vpop.f32.mrb[1].mxu0 }
 0x106   :  { %v130_v12 = vadd.f32 %v159_v8, %v129_v11 }
 0x107   :  { %140 = vst.msk [vmem:[#allocation7 + $0x8] sm:$0xff] %vm138_vm1, %v135_v10 }
 0x108   :  { %139 = vst.msk [vmem:[#allocation7] sm:$0xff] %vm138_vm1, %v130_v12 }
 0x109   :  { %247 = shalt.err (!%p244_p6)
}
 0x10a   :  { %s248_s2 = scalar_lea.hbm %s340_s3, 256 }
 0x10b   :  { %p249_p7 = scmp.ne.s32.totalorder %s340_s3, %s248_s2  ;;  %p252_p8 = scmp.lt.u32.totalorder %s248_s2, %s340_s3 }
 0x10d   :  { %p254_p9 = pnand %p252_p8, %p249_p7 }
 0x10f   :  { %257 = shalt.err (!%p254_p9)
}
 0x110   :  { %152 = dma.vmem_to_hbm [thread:$0]  %s147_s12, 256, %s340_s3, [#allocation4], %s265_s22, %s265_s22, %s266_s23  }
 0x111   :  { %262 = dma.done.wait [#allocation4], 256  }
 0x112   :  { %263 = vsyncadd [#allocation4], 4294967040 }
 0x113   :  { %156 = vsyncpa [#allocation3], 1 }
 0x114   :  { %157 = vsyncpa [#allocation6], 1 }
 0x115   :  { %158 = vsyncpa [#allocation4], 1 }

</bundles_post_ra>
